<compile_context>
chip_gen: v5e
topology: v5e:2x2
jax: 0.10.0
libtpu: 0.0.40
codegen_flags: <defaults>
</compile_context>

<pallas_src>
import functools

import jax
import jax.numpy as jnp
from jax.experimental import pallas as pl
from jax.experimental.pallas import tpu as pltpu


def _round_up(x, m):
    return ((x + m - 1) // m) * m


# ---------------------------------------------------------------------------
# Kernel: one batch tile, all weights VMEM-resident.
# ---------------------------------------------------------------------------
def vae_kernel(x_ref, eps_ref,
               w1_ref, b1_ref, w2_ref, b2_ref,
               wmu_ref, bmu_ref, wlv_ref, blv_ref,
               w4_ref, b4_ref, w5_ref, b5_ref, w6_ref, b6_ref,
               recon_ref, mu_ref, logvar_ref):
    latent_dim = mu_ref.shape[-1]

    def dense(a, w_ref, b_ref):
        # bf16 MXU operands, f32 accumulation; bias added in f32.
        return jnp.dot(a.astype(jnp.bfloat16), w_ref[...],
                       preferred_element_type=jnp.float32) + b_ref[...]

    x = x_ref[...]                                          # (TB, input_dim) bf16

    # ---- encoder ----
    h = jnp.maximum(dense(x, w1_ref, b1_ref), 0.0)          # (TB, 128)
    h = jnp.maximum(dense(h, w2_ref, b2_ref), 0.0)          # (TB, 64)

    # mu / logvar heads: separate lane-0-aligned dots (no chunk() slicing).
    # Padded weight/bias lanes are zero -> padded mu/logvar lanes are exactly 0.
    mu = dense(h, wmu_ref, bmu_ref)                         # (TB, LP)
    logvar = dense(h, wlv_ref, blv_ref)                     # (TB, LP)

    # ---- reparameterization (f32 on VPU, exp on EUP) ----
    # eps padded lanes are 0 and exp(0)*0 + 0 == 0, so padded z lanes stay 0;
    # w4's padded rows are zero as well, so they never reach the decoder.
    z = mu + jnp.exp(0.5 * logvar) * eps_ref[...]           # (TB, LP)

    # ---- decoder ----
    d = jnp.maximum(dense(z, w4_ref, b4_ref), 0.0)          # (TB, 64)
    d = jnp.maximum(dense(d, w5_ref, b5_ref), 0.0)          # (TB, 128)
    recon_ref[...] = dense(d, w6_ref, b6_ref)               # (TB, input_dim)

    # Narrow outputs: lane-0-aligned slices of the latent tiles.
    mu_ref[...] = mu[:, :latent_dim]
    logvar_ref[...] = logvar[:, :latent_dim]


# ---------------------------------------------------------------------------
# Wrapper: host-side param packing/padding + batch-tiled pallas_call.
# ---------------------------------------------------------------------------
@functools.partial(jax.jit, static_argnames=("tb",))
def vae_forward(x, eps, params, *, tb=None):
    """VAE forward. x:(B, input_dim) f32, eps:(B, latent_dim) f32 ~ N(0,1)."""
    B, input_dim = x.shape
    latent_dim = eps.shape[-1]
    (w1, b1, w2, b2, w3, b3, w4, b4, w5, b5, w6, b6) = params

    LP = _round_up(latent_dim, 8)     # padded latent width (lane padding only)

    pad_cols = lambda a, w: jnp.pad(a, ((0, 0), (0, w - a.shape[1])))
    pad_rows = lambda a, h: jnp.pad(a, ((0, h - a.shape[0]), (0, 0)))

    # Split the mu/logvar head; pad latent dims to LP with zeros.
    w_mu, w_lv = w3[:, :latent_dim], w3[:, latent_dim:]
    b_mu, b_lv = b3[:, :latent_dim], b3[:, latent_dim:]

    # Weights in bf16 (halves VMEM/DMA, bf16-native MXU); biases stay f32.
    bf = lambda w: w.astype(jnp.bfloat16)
    weights = [bf(w1), b1, bf(w2), b2,
               bf(pad_cols(w_mu, LP)), pad_cols(b_mu, LP),
               bf(pad_cols(w_lv, LP)), pad_cols(b_lv, LP),
               bf(pad_rows(w4, LP)), b4, bf(w5), b5, bf(w6), b6]

    # x in bf16 (kernel casts to bf16 at the first dot anyway), eps stays f32.
    x_bf = x.astype(jnp.bfloat16)
    eps_p = pad_cols(eps, LP)                                # (B, LP) f32

    # Batch tile: big tiles amortize the ~0.35us per-grid-step overhead; VMEM
    # footprint stays far below the scoped limit even at 4096 rows.
    if tb is None:
        tb = 4096
    tb = _round_up(min(tb, _round_up(B, 16)), 16)            # bf16 sublane tile
    B_pad = _round_up(B, tb)
    if B_pad != B:
        x_bf = jnp.pad(x_bf, ((0, B_pad - B), (0, 0)))
        eps_p = jnp.pad(eps_p, ((0, B_pad - B), (0, 0)))

    grid = (B_pad // tb,)
    row_spec = lambda width: pl.BlockSpec((tb, width), lambda i: (i, 0))
    const_spec = lambda a: pl.BlockSpec(a.shape, lambda i: (0, 0))

    recon, mu, logvar = pl.pallas_call(
        vae_kernel,
        out_shape=(jax.ShapeDtypeStruct((B_pad, input_dim), jnp.float32),
                   jax.ShapeDtypeStruct((B_pad, latent_dim), jnp.float32),
                   jax.ShapeDtypeStruct((B_pad, latent_dim), jnp.float32)),
        grid=grid,
        in_specs=[row_spec(input_dim), row_spec(LP)]
                 + [const_spec(a) for a in weights],
        out_specs=(row_spec(input_dim), row_spec(latent_dim),
                   row_spec(latent_dim)),
        compiler_params=pltpu.CompilerParams(
            dimension_semantics=("parallel",)),   # shards tiles across v7x TCs
    )(x_bf, eps_p, *weights)

    if B_pad != B:
        recon, mu, logvar = recon[:B], mu[:B], logvar[:B]
    return recon, mu, logvar


# ---------------------------------------------------------------------------
# Reference (pure JAX, f32) and parameter init matching nn.Linear shapes.
# ---------------------------------------------------------------------------
def init_params(key, input_dim, latent_dim):
    layer_dims = [
        (input_dim, 128), (128, 64), (64, latent_dim * 2),      # encoder
        (latent_dim, 64), (64, 128), (128, input_dim),          # decoder
    ]
    params = []
    for fan_in, fan_out in layer_dims:
        key, wk, bk = jax.random.split(key, 3)
        bound = 1.0 / float(fan_in) ** 0.5
        w = jax.random.uniform(wk, (fan_in, fan_out), jnp.float32, -bound, bound)
        b = jax.random.uniform(bk, (1, fan_out), jnp.float32, -bound, bound)
        params += [w, b]
    return tuple(params)


def reference_forward(x, eps, params):
    (w1, b1, w2, b2, w3, b3, w4, b4, w5, b5, w6, b6) = params
    latent_dim = eps.shape[-1]
    h = jnp.maximum(x @ w1 + b1, 0.0)
    h = jnp.maximum(h @ w2 + b2, 0.0)
    ml = h @ w3 + b3
    mu, logvar = ml[:, :latent_dim], ml[:, latent_dim:]
    z = mu + jnp.exp(0.5 * logvar) * eps
    d = jnp.maximum(z @ w4 + b4, 0.0)
    d = jnp.maximum(d @ w5 + b5, 0.0)
    return d @ w6 + b6, mu, logvar


if __name__ == "__main__":
    INPUT_DIM, LATENT_DIM = 32, 2

    key = jax.random.PRNGKey(0)
    key, pk = jax.random.split(key)
    params = init_params(pk, INPUT_DIM, LATENT_DIM)

    # bf16 MXU operands -> loosened tolerance vs. the f32 reference.
    ATOL = RTOL = 2e-2

    # Case 1: small single-tile batch.
    key, xk, ek = jax.random.split(key, 3)
    x = jax.random.normal(xk, (8, INPUT_DIM), jnp.float32)
    eps = jax.random.normal(ek, (8, LATENT_DIM), jnp.float32)  # torch.randn_like
    recon, mu, logvar = vae_forward(x, eps, params)
    jax.block_until_ready((recon, mu, logvar))
    r_ref, mu_ref, lv_ref = reference_forward(x, eps, params)
    assert recon.shape == (8, INPUT_DIM) and mu.shape == (8, LATENT_DIM)
    assert jnp.allclose(recon, r_ref, atol=ATOL, rtol=RTOL)
    assert jnp.allclose(mu, mu_ref, atol=ATOL, rtol=RTOL)
    assert jnp.allclose(logvar, lv_ref, atol=ATOL, rtol=RTOL)

    # Case 2: exercise the multi-tile grid + batch-padding path (B=40, tb=16).
    key, xk, ek = jax.random.split(key, 3)
    x2 = jax.random.normal(xk, (40, INPUT_DIM), jnp.float32)
    eps2 = jax.random.normal(ek, (40, LATENT_DIM), jnp.float32)
    recon2, mu2, lv2 = vae_forward(x2, eps2, params, tb=16)
    jax.block_until_ready((recon2, mu2, lv2))
    r2_ref, mu2_ref, lv2_ref = reference_forward(x2, eps2, params)
    assert jnp.allclose(recon2, r2_ref, atol=ATOL, rtol=RTOL)
    assert jnp.allclose(mu2, mu2_ref, atol=ATOL, rtol=RTOL)
    assert jnp.allclose(lv2, lv2_ref, atol=ATOL, rtol=RTOL)

    print("KERNEL_OK")
</pallas_src>

<mosaic_0001>
module attributes {stable_mosaic.version = 11 : i64} {
  func.func @vae_kernel(%arg0: i32, %arg1: memref<16x32xbf16, #tpu.memory_space<vmem>>, %arg2: memref<16x8xf32, #tpu.memory_space<vmem>>, %arg3: memref<32x128xbf16, #tpu.memory_space<vmem>>, %arg4: memref<1x128xf32, #tpu.memory_space<vmem>>, %arg5: memref<128x64xbf16, #tpu.memory_space<vmem>>, %arg6: memref<1x64xf32, #tpu.memory_space<vmem>>, %arg7: memref<64x8xbf16, #tpu.memory_space<vmem>>, %arg8: memref<1x8xf32, #tpu.memory_space<vmem>>, %arg9: memref<64x8xbf16, #tpu.memory_space<vmem>>, %arg10: memref<1x8xf32, #tpu.memory_space<vmem>>, %arg11: memref<8x64xbf16, #tpu.memory_space<vmem>>, %arg12: memref<1x64xf32, #tpu.memory_space<vmem>>, %arg13: memref<64x128xbf16, #tpu.memory_space<vmem>>, %arg14: memref<1x128xf32, #tpu.memory_space<vmem>>, %arg15: memref<128x32xbf16, #tpu.memory_space<vmem>>, %arg16: memref<1x32xf32, #tpu.memory_space<vmem>>, %arg17: memref<16x32xf32, #tpu.memory_space<vmem>>, %arg18: memref<16x2xf32, #tpu.memory_space<vmem>>, %arg19: memref<16x2xf32, #tpu.memory_space<vmem>>) attributes {dimension_semantics = [#tpu.dimension_semantics<parallel>], iteration_bounds = array<i64: 1>, scalar_prefetch = 0 : i64, scratch_operands = 0 : i64, tpu.core_type = #tpu.core_type<tc>, window_params = [{transform_indices = @transform_0, window_bounds = array<i64: 16, 32>}, {transform_indices = @transform_1, window_bounds = array<i64: 16, 8>}, {pipeline_mode = #tpu.pipeline_mode<synchronous>, transform_indices = @transform_2, window_bounds = array<i64: 32, 128>}, {pipeline_mode = #tpu.pipeline_mode<synchronous>, transform_indices = @transform_3, window_bounds = array<i64: 1, 128>}, {pipeline_mode = #tpu.pipeline_mode<synchronous>, transform_indices = @transform_4, window_bounds = array<i64: 128, 64>}, {pipeline_mode = #tpu.pipeline_mode<synchronous>, transform_indices = @transform_5, window_bounds = array<i64: 1, 64>}, {pipeline_mode = #tpu.pipeline_mode<synchronous>, transform_indices = @transform_6, window_bounds = array<i64: 64, 8>}, {pipeline_mode = #tpu.pipeline_mode<synchronous>, transform_indices = @transform_7, window_bounds = array<i64: 1, 8>}, {pipeline_mode = #tpu.pipeline_mode<synchronous>, transform_indices = @transform_8, window_bounds = array<i64: 64, 8>}, {pipeline_mode = #tpu.pipeline_mode<synchronous>, transform_indices = @transform_9, window_bounds = array<i64: 1, 8>}, {pipeline_mode = #tpu.pipeline_mode<synchronous>, transform_indices = @transform_10, window_bounds = array<i64: 8, 64>}, {pipeline_mode = #tpu.pipeline_mode<synchronous>, transform_indices = @transform_11, window_bounds = array<i64: 1, 64>}, {pipeline_mode = #tpu.pipeline_mode<synchronous>, transform_indices = @transform_12, window_bounds = array<i64: 64, 128>}, {pipeline_mode = #tpu.pipeline_mode<synchronous>, transform_indices = @transform_13, window_bounds = array<i64: 1, 128>}, {pipeline_mode = #tpu.pipeline_mode<synchronous>, transform_indices = @transform_14, window_bounds = array<i64: 128, 32>}, {pipeline_mode = #tpu.pipeline_mode<synchronous>, transform_indices = @transform_15, window_bounds = array<i64: 1, 32>}, {transform_indices = @transform_16, window_bounds = array<i64: 16, 32>}, {transform_indices = @transform_17, window_bounds = array<i64: 16, 2>}, {transform_indices = @transform_18, window_bounds = array<i64: 16, 2>}]} {
    %c0 = arith.constant 0 : index
    %c0_0 = arith.constant 0 : index
    %0 = vector.load %arg1[%c0, %c0_0] : memref<16x32xbf16, #tpu.memory_space<vmem>>, vector<16x32xbf16>
    %c0_1 = arith.constant 0 : index
    %c0_2 = arith.constant 0 : index
    %1 = vector.load %arg3[%c0_1, %c0_2] : memref<32x128xbf16, #tpu.memory_space<vmem>>, vector<32x128xbf16>
    %cst = arith.constant dense<0.000000e+00> : vector<16x128xf32>
    %2 = tpu.matmul %0, %1, %cst {dimension_numbers = #tpu.dot_dimension_numbers<[1], [0], [0], [1], [0, 0, 1, 1], [], []>} : vector<16x32xbf16>, vector<32x128xbf16>, vector<16x128xf32> -> vector<16x128xf32>
    %c0_3 = arith.constant 0 : index
    %c0_4 = arith.constant 0 : index
    %3 = vector.load %arg4[%c0_3, %c0_4] : memref<1x128xf32, #tpu.memory_space<vmem>>, vector<1x128xf32>
    %4 = vector.broadcast %3 : vector<1x128xf32> to vector<16x128xf32>
    %5 = arith.addf %2, %4 : vector<16x128xf32>
    %cst_5 = arith.constant 0.000000e+00 : f32
    %6 = vector.broadcast %cst_5 : f32 to vector<16x128xf32>
    %7 = arith.maximumf %5, %6 : vector<16x128xf32>
    %8 = arith.truncf %7 : vector<16x128xf32> to vector<16x128xbf16>
    %c0_6 = arith.constant 0 : index
    %c0_7 = arith.constant 0 : index
    %9 = vector.load %arg5[%c0_6, %c0_7] : memref<128x64xbf16, #tpu.memory_space<vmem>>, vector<128x64xbf16>
    %cst_8 = arith.constant dense<0.000000e+00> : vector<16x64xf32>
    %10 = tpu.matmul %8, %9, %cst_8 {dimension_numbers = #tpu.dot_dimension_numbers<[1], [0], [0], [1], [0, 0, 1, 1], [], []>} : vector<16x128xbf16>, vector<128x64xbf16>, vector<16x64xf32> -> vector<16x64xf32>
    %c0_9 = arith.constant 0 : index
    %c0_10 = arith.constant 0 : index
    %11 = vector.load %arg6[%c0_9, %c0_10] : memref<1x64xf32, #tpu.memory_space<vmem>>, vector<1x64xf32>
    %12 = vector.broadcast %11 : vector<1x64xf32> to vector<16x64xf32>
    %13 = arith.addf %10, %12 : vector<16x64xf32>
    %cst_11 = arith.constant 0.000000e+00 : f32
    %14 = vector.broadcast %cst_11 : f32 to vector<16x64xf32>
    %15 = arith.maximumf %13, %14 : vector<16x64xf32>
    %16 = arith.truncf %15 : vector<16x64xf32> to vector<16x64xbf16>
    %c0_12 = arith.constant 0 : index
    %c0_13 = arith.constant 0 : index
    %17 = vector.load %arg7[%c0_12, %c0_13] : memref<64x8xbf16, #tpu.memory_space<vmem>>, vector<64x8xbf16>
    %cst_14 = arith.constant dense<0.000000e+00> : vector<16x8xf32>
    %18 = tpu.matmul %16, %17, %cst_14 {dimension_numbers = #tpu.dot_dimension_numbers<[1], [0], [0], [1], [0, 0, 1, 1], [], []>} : vector<16x64xbf16>, vector<64x8xbf16>, vector<16x8xf32> -> vector<16x8xf32>
    %c0_15 = arith.constant 0 : index
    %c0_16 = arith.constant 0 : index
    %19 = vector.load %arg8[%c0_15, %c0_16] : memref<1x8xf32, #tpu.memory_space<vmem>>, vector<1x8xf32>
    %20 = vector.broadcast %19 : vector<1x8xf32> to vector<16x8xf32>
    %21 = arith.addf %18, %20 : vector<16x8xf32>
    %22 = arith.truncf %15 : vector<16x64xf32> to vector<16x64xbf16>
    %c0_17 = arith.constant 0 : index
    %c0_18 = arith.constant 0 : index
    %23 = vector.load %arg9[%c0_17, %c0_18] : memref<64x8xbf16, #tpu.memory_space<vmem>>, vector<64x8xbf16>
    %cst_19 = arith.constant dense<0.000000e+00> : vector<16x8xf32>
    %24 = tpu.matmul %22, %23, %cst_19 {dimension_numbers = #tpu.dot_dimension_numbers<[1], [0], [0], [1], [0, 0, 1, 1], [], []>} : vector<16x64xbf16>, vector<64x8xbf16>, vector<16x8xf32> -> vector<16x8xf32>
    %c0_20 = arith.constant 0 : index
    %c0_21 = arith.constant 0 : index
    %25 = vector.load %arg10[%c0_20, %c0_21] : memref<1x8xf32, #tpu.memory_space<vmem>>, vector<1x8xf32>
    %26 = vector.broadcast %25 : vector<1x8xf32> to vector<16x8xf32>
    %27 = arith.addf %24, %26 : vector<16x8xf32>
    %cst_22 = arith.constant 5.000000e-01 : f32
    %28 = vector.broadcast %cst_22 : f32 to vector<16x8xf32>
    %29 = arith.mulf %28, %27 : vector<16x8xf32>
    %30 = math.exp %29 : vector<16x8xf32>
    %c0_23 = arith.constant 0 : index
    %c0_24 = arith.constant 0 : index
    %31 = vector.load %arg2[%c0_23, %c0_24] : memref<16x8xf32, #tpu.memory_space<vmem>>, vector<16x8xf32>
    %32 = arith.mulf %30, %31 : vector<16x8xf32>
    %33 = arith.addf %21, %32 : vector<16x8xf32>
    %34 = arith.truncf %33 : vector<16x8xf32> to vector<16x8xbf16>
    %c0_25 = arith.constant 0 : index
    %c0_26 = arith.constant 0 : index
    %35 = vector.load %arg11[%c0_25, %c0_26] : memref<8x64xbf16, #tpu.memory_space<vmem>>, vector<8x64xbf16>
    %cst_27 = arith.constant dense<0.000000e+00> : vector<16x64xf32>
    %36 = tpu.matmul %34, %35, %cst_27 {dimension_numbers = #tpu.dot_dimension_numbers<[1], [0], [0], [1], [0, 0, 1, 1], [], []>} : vector<16x8xbf16>, vector<8x64xbf16>, vector<16x64xf32> -> vector<16x64xf32>
    %c0_28 = arith.constant 0 : index
    %c0_29 = arith.constant 0 : index
    %37 = vector.load %arg12[%c0_28, %c0_29] : memref<1x64xf32, #tpu.memory_space<vmem>>, vector<1x64xf32>
    %38 = vector.broadcast %37 : vector<1x64xf32> to vector<16x64xf32>
    %39 = arith.addf %36, %38 : vector<16x64xf32>
    %cst_30 = arith.constant 0.000000e+00 : f32
    %40 = vector.broadcast %cst_30 : f32 to vector<16x64xf32>
    %41 = arith.maximumf %39, %40 : vector<16x64xf32>
    %42 = arith.truncf %41 : vector<16x64xf32> to vector<16x64xbf16>
    %c0_31 = arith.constant 0 : index
    %c0_32 = arith.constant 0 : index
    %43 = vector.load %arg13[%c0_31, %c0_32] : memref<64x128xbf16, #tpu.memory_space<vmem>>, vector<64x128xbf16>
    %cst_33 = arith.constant dense<0.000000e+00> : vector<16x128xf32>
    %44 = tpu.matmul %42, %43, %cst_33 {dimension_numbers = #tpu.dot_dimension_numbers<[1], [0], [0], [1], [0, 0, 1, 1], [], []>} : vector<16x64xbf16>, vector<64x128xbf16>, vector<16x128xf32> -> vector<16x128xf32>
    %c0_34 = arith.constant 0 : index
    %c0_35 = arith.constant 0 : index
    %45 = vector.load %arg14[%c0_34, %c0_35] : memref<1x128xf32, #tpu.memory_space<vmem>>, vector<1x128xf32>
    %46 = vector.broadcast %45 : vector<1x128xf32> to vector<16x128xf32>
    %47 = arith.addf %44, %46 : vector<16x128xf32>
    %cst_36 = arith.constant 0.000000e+00 : f32
    %48 = vector.broadcast %cst_36 : f32 to vector<16x128xf32>
    %49 = arith.maximumf %47, %48 : vector<16x128xf32>
    %50 = arith.truncf %49 : vector<16x128xf32> to vector<16x128xbf16>
    %c0_37 = arith.constant 0 : index
    %c0_38 = arith.constant 0 : index
    %51 = vector.load %arg15[%c0_37, %c0_38] : memref<128x32xbf16, #tpu.memory_space<vmem>>, vector<128x32xbf16>
    %cst_39 = arith.constant dense<0.000000e+00> : vector<16x32xf32>
    %52 = tpu.matmul %50, %51, %cst_39 {dimension_numbers = #tpu.dot_dimension_numbers<[1], [0], [0], [1], [0, 0, 1, 1], [], []>} : vector<16x128xbf16>, vector<128x32xbf16>, vector<16x32xf32> -> vector<16x32xf32>
    %c0_40 = arith.constant 0 : index
    %c0_41 = arith.constant 0 : index
    %53 = vector.load %arg16[%c0_40, %c0_41] : memref<1x32xf32, #tpu.memory_space<vmem>>, vector<1x32xf32>
    %54 = vector.broadcast %53 : vector<1x32xf32> to vector<16x32xf32>
    %55 = arith.addf %52, %54 : vector<16x32xf32>
    %c0_42 = arith.constant 0 : index
    %c0_43 = arith.constant 0 : index
    %56 = vector.load %arg17[%c0_42, %c0_43] : memref<16x32xf32, #tpu.memory_space<vmem>>, vector<16x32xf32>
    tpu.vector_store %arg17[%c0_42, %c0_43], %55 {strides = array<i32>} : memref<16x32xf32, #tpu.memory_space<vmem>>, vector<16x32xf32>,
    %57 = vector.extract_strided_slice %21 {offsets = [0, 0], sizes = [16, 2], strides = [1, 1]} : vector<16x8xf32> to vector<16x2xf32>
    %c0_44 = arith.constant 0 : index
    %c0_45 = arith.constant 0 : index
    %58 = vector.load %arg18[%c0_44, %c0_45] : memref<16x2xf32, #tpu.memory_space<vmem>>, vector<16x2xf32>
    tpu.vector_store %arg18[%c0_44, %c0_45], %57 {strides = array<i32>} : memref<16x2xf32, #tpu.memory_space<vmem>>, vector<16x2xf32>,
    %59 = vector.extract_strided_slice %27 {offsets = [0, 0], sizes = [16, 2], strides = [1, 1]} : vector<16x8xf32> to vector<16x2xf32>
    %c0_46 = arith.constant 0 : index
    %c0_47 = arith.constant 0 : index
    %60 = vector.load %arg19[%c0_46, %c0_47] : memref<16x2xf32, #tpu.memory_space<vmem>>, vector<16x2xf32>
    tpu.vector_store %arg19[%c0_46, %c0_47], %59 {strides = array<i32>} : memref<16x2xf32, #tpu.memory_space<vmem>>, vector<16x2xf32>,
    return
  }
  func.func @transform_0(%arg0: i32) -> (i32, i32) {
    %c0_i32 = arith.constant 0 : i32
    %c0_i32_0 = arith.constant 0 : i32
    return %arg0, %c0_i32 : i32, i32
  }
  func.func @transform_1(%arg0: i32) -> (i32, i32) {
    %c0_i32 = arith.constant 0 : i32
    %c0_i32_0 = arith.constant 0 : i32
    return %arg0, %c0_i32 : i32, i32
  }
  func.func @transform_2(%arg0: i32) -> (i32, i32) {
    %c0_i32 = arith.constant 0 : i32
    %c0_i32_0 = arith.constant 0 : i32
    %c0_i32_1 = arith.constant 0 : i32
    return %c0_i32, %c0_i32_0 : i32, i32
  }
  func.func @transform_3(%arg0: i32) -> (i32, i32) {
    %c0_i32 = arith.constant 0 : i32
    %c0_i32_0 = arith.constant 0 : i32
    %c0_i32_1 = arith.constant 0 : i32
    return %c0_i32, %c0_i32_0 : i32, i32
  }
  func.func @transform_4(%arg0: i32) -> (i32, i32) {
    %c0_i32 = arith.constant 0 : i32
    %c0_i32_0 = arith.constant 0 : i32
    %c0_i32_1 = arith.constant 0 : i32
    return %c0_i32, %c0_i32_0 : i32, i32
  }
  func.func @transform_5(%arg0: i32) -> (i32, i32) {
    %c0_i32 = arith.constant 0 : i32
    %c0_i32_0 = arith.constant 0 : i32
    %c0_i32_1 = arith.constant 0 : i32
    return %c0_i32, %c0_i32_0 : i32, i32
  }
  func.func @transform_6(%arg0: i32) -> (i32, i32) {
    %c0_i32 = arith.constant 0 : i32
    %c0_i32_0 = arith.constant 0 : i32
    %c0_i32_1 = arith.constant 0 : i32
    return %c0_i32, %c0_i32_0 : i32, i32
  }
  func.func @transform_7(%arg0: i32) -> (i32, i32) {
    %c0_i32 = arith.constant 0 : i32
    %c0_i32_0 = arith.constant 0 : i32
    %c0_i32_1 = arith.constant 0 : i32
    return %c0_i32, %c0_i32_0 : i32, i32
  }
  func.func @transform_8(%arg0: i32) -> (i32, i32) {
    %c0_i32 = arith.constant 0 : i32
    %c0_i32_0 = arith.constant 0 : i32
    %c0_i32_1 = arith.constant 0 : i32
    return %c0_i32, %c0_i32_0 : i32, i32
  }
  func.func @transform_9(%arg0: i32) -> (i32, i32) {
    %c0_i32 = arith.constant 0 : i32
    %c0_i32_0 = arith.constant 0 : i32
    %c0_i32_1 = arith.constant 0 : i32
    return %c0_i32, %c0_i32_0 : i32, i32
  }
  func.func @transform_10(%arg0: i32) -> (i32, i32) {
    %c0_i32 = arith.constant 0 : i32
    %c0_i32_0 = arith.constant 0 : i32
    %c0_i32_1 = arith.constant 0 : i32
    return %c0_i32, %c0_i32_0 : i32, i32
  }
  func.func @transform_11(%arg0: i32) -> (i32, i32) {
    %c0_i32 = arith.constant 0 : i32
    %c0_i32_0 = arith.constant 0 : i32
    %c0_i32_1 = arith.constant 0 : i32
    return %c0_i32, %c0_i32_0 : i32, i32
  }
  func.func @transform_12(%arg0: i32) -> (i32, i32) {
    %c0_i32 = arith.constant 0 : i32
    %c0_i32_0 = arith.constant 0 : i32
    %c0_i32_1 = arith.constant 0 : i32
    return %c0_i32, %c0_i32_0 : i32, i32
  }
  func.func @transform_13(%arg0: i32) -> (i32, i32) {
    %c0_i32 = arith.constant 0 : i32
    %c0_i32_0 = arith.constant 0 : i32
    %c0_i32_1 = arith.constant 0 : i32
    return %c0_i32, %c0_i32_0 : i32, i32
  }
  func.func @transform_14(%arg0: i32) -> (i32, i32) {
    %c0_i32 = arith.constant 0 : i32
    %c0_i32_0 = arith.constant 0 : i32
    %c0_i32_1 = arith.constant 0 : i32
    return %c0_i32, %c0_i32_0 : i32, i32
  }
  func.func @transform_15(%arg0: i32) -> (i32, i32) {
    %c0_i32 = arith.constant 0 : i32
    %c0_i32_0 = arith.constant 0 : i32
    %c0_i32_1 = arith.constant 0 : i32
    return %c0_i32, %c0_i32_0 : i32, i32
  }
  func.func @transform_16(%arg0: i32) -> (i32, i32) {
    %c0_i32 = arith.constant 0 : i32
    %c0_i32_0 = arith.constant 0 : i32
    return %arg0, %c0_i32 : i32, i32
  }
  func.func @transform_17(%arg0: i32) -> (i32, i32) {
    %c0_i32 = arith.constant 0 : i32
    %c0_i32_0 = arith.constant 0 : i32
    return %arg0, %c0_i32 : i32, i32
  }
  func.func @transform_18(%arg0: i32) -> (i32, i32) {
    %c0_i32 = arith.constant 0 : i32
    %c0_i32_0 = arith.constant 0 : i32
    return %arg0, %c0_i32 : i32, i32
  }
}

</mosaic_0001>

<bundles_post_ra>
// kernel: vae_forward.1
= control target key start
LH: loop header
LB: loop body
LE: loop exit
PB: predicated region body
PF: predicated region fallthrough
CT: control target
= control target key end

     0   :  { %vm84_vm0 = vcmask 261120   ;;  %vm226_vm1 = vcmask 523264   ;;  %vm316_vm2 = vcmask 1043456   ;;  %vm477_vm3 = vcmask 15360   ;;  %s911_s2 = inlined_call_operand.vmem [shape: bf16[32,128], index: 2, kind: input, shape index: {}]   ;;  %s912_s4 = inlined_call_operand.vmem [shape: bf16[128,64], index: 4, kind: input, shape index: {}]   ;;  %s913_s3 = inlined_call_operand.vmem [shape: f32[1,128], index: 3, kind: input, shape index: {}]   ;;  %s914_s0 = inlined_call_operand.vmem [shape: bf16[16,32], index: 0, kind: input, shape index: {}]   ;;  %s915_s5 = inlined_call_operand.vmem [shape: f32[1,64], index: 5, kind: input, shape index: {}]   ;;  %s916_s8 = inlined_call_operand.vmem [shape: bf16[64,8], index: 8, kind: input, shape index: {}]   ;;  %s917_s9 = inlined_call_operand.vmem [shape: f32[1,8], index: 9, kind: input, shape index: {}]   ;;  %s918_s6 = inlined_call_operand.vmem [shape: bf16[64,8], index: 6, kind: input, shape index: {}]   ;;  %s919_s7 = inlined_call_operand.vmem [shape: f32[1,8], index: 7, kind: input, shape index: {}]   ;;  %s920_s11 = inlined_call_operand.vmem [shape: f32[1,64], index: 11, kind: input, shape index: {}]   ;;  %s921_s10 = inlined_call_operand.vmem [shape: bf16[8,64], index: 10, kind: input, shape index: {}]   ;;  %s922_s12 = inlined_call_operand.vmem [shape: bf16[64,128], index: 12, kind: input, shape index: {}]   ;;  %s923_s18 = inlined_call_operand.vmem [shape: f32[16,2], index: 18, kind: output, shape index: {2}]   ;;  %s924_s17 = inlined_call_operand.vmem [shape: f32[16,2], index: 17, kind: output, shape index: {1}]   ;;  %s925_s1 = inlined_call_operand.vmem [shape: f32[16,8], index: 1, kind: input, shape index: {}]   ;;  %s926_s13 = inlined_call_operand.vmem [shape: f32[1,128], index: 13, kind: input, shape index: {}]   ;;  %s927_s14 = inlined_call_operand.vmem [shape: bf16[128,32], index: 14, kind: input, shape index: {}]   ;;  %s928_s15 = inlined_call_operand.vmem [shape: f32[1,32], index: 15, kind: input, shape index: {}]   ;;  %s929_s16 = inlined_call_operand.vmem [shape: f32[16,32], index: 16, kind: output, shape index: {0}]  }
   0x1   :  { %932 = sst [smem:[#allocation2_spill]] %s911_s2  ;;  %v623_v4 = vld [vmem:[%s914_s0] sm:$0xff]  ;;  %v641_v11 = vld [vmem:[%s916_s8 + $0x18] sm:$0xff]  ;;  %v640_v21 = vld [vmem:[%s916_s8 + $0x10] sm:$0xff]  ;;  %vm312_vm4 = vcmask 64512  }
   0x2   :  { %933 = sst [smem:[#allocation3_spill]] %s912_s4  ;;  %v637_v20 = vld [vmem:[%s918_s6 + $0x18] sm:$0xff]  ;;  %v636_v22 = vld [vmem:[%s918_s6 + $0x10] sm:$0xff]  ;;  %v639_v23 = vld [vmem:[%s916_s8 + $0x8] sm:$0xff] }
   0x3   :  { %934 = sst [smem:[#allocation4_spill]] %s913_s3  ;;  %234 = vmatpush.bf16.msra.mxu2 %v637_v20  ;;  %v635_v24 = vld [vmem:[%s918_s6 + $0x8] sm:$0xff]  ;;  %v638_v25 = vld [vmem:[%s916_s8] sm:$0xff]  ;;  %v645_v37 = vld [vmem:[%s922_s12 + $0x18] sm:$0xff] }
   0x4   :  { %935 = sst [smem:[#allocation5_spill]] %s920_s11  ;;  %v634_v26 = vld [vmem:[%s918_s6] sm:$0xff]  ;;  %v301_v54 = vld [vmem:[%s925_s1 + $0x8] sm:$0xff]  ;;  %v644_v61 = vld [vmem:[%s922_s12 + $0x10] sm:$0xff] }
   0x5   :  { %s936_s29 = sld [smem:[#allocation2_spill]]  ;;  %v655_v28 = vld [vmem:[%s915_s5] ss:$0 sm:$0xff]  ;;  %v643_v62 = vld [vmem:[%s922_s12 + $0x8] sm:$0xff] }
   0x6   :  { %s937_s11 = sld [smem:[#allocation3_spill]]  ;;  %v307_v35 = vld [vmem:[%s921_s10] sm:$0xf] }
   0x7   :  { %s938_s23 = sld [smem:[#allocation4_spill]]  ;;  %235 = vmatpush.bf16.msra.mxu2 %v636_v22  ;;  %v318_v36 = vsel %vm316_vm2, %v307_v35, 0  ;;  %v656_v38 = vld [vmem:[%s917_s9] ss:$0 sm:$0xff] }
   0x8   :  { %v657_v42 = vld [vmem:[%s919_s7] ss:$0 sm:$0xff]  ;;  %s939_s27 = sld [smem:[#allocation5_spill]] }
   0x9   :  { %v300_v53 = vld [vmem:[%s925_s1] sm:$0xff] }
   0xa   :  { %v642_v63 = vld [vmem:[%s922_s12] sm:$0xff] }
   0xb   :  { %v625_v0 = vld [vmem:[%s936_s29 + $0x8] sm:$0xff]  ;;  %v624_v2 = vld [vmem:[%s936_s29] sm:$0xff]  ;;  %236 = vmatpush.bf16.msra.mxu2 %v635_v24 }
   0xc   :  { %v633_v1 = vld [vmem:[%s937_s11 + $0x38] sm:$0xff]  ;;  %94 = vmatpush.bf16.msra.mxu0 %v625_v0  ;;  %v632_v3 = vld [vmem:[%s937_s11 + $0x30] sm:$0xff]  ;;  %v631_v5 = vld [vmem:[%s937_s11 + $0x28] sm:$0xff] }
   0xd   :  { %173 = vmatpush.bf16.msra.mxu1 %v633_v1  ;;  %v630_v6 = vld [vmem:[%s937_s11 + $0x20] sm:$0xff]  ;;  %v629_v7 = vld [vmem:[%s937_s11 + $0x18] sm:$0xff]  ;;  %v628_v8 = vld [vmem:[%s937_s11 + $0x10] sm:$0xff] }
   0xe   :  { %v627_v9 = vld [vmem:[%s937_s11 + $0x8] sm:$0xff]  ;;  %v626_v10 = vld [vmem:[%s937_s11] sm:$0xff]  ;;  %v653_v0 = vld [vmem:[%s927_s14 + $0x38] sm:$0xff] }
   0xf   :  { %v654_v13 = vld [vmem:[%s938_s23] ss:$0 sm:$0xff]  ;;  %237 = vmatpush.bf16.msra.mxu2 %v634_v26  ;;  %461 = vmatpush.bf16.msra.mxu3 %v653_v0  ;;  %v652_v1 = vld [vmem:[%s927_s14 + $0x30] sm:$0xff] }
  0x10   :  { %95 = vmatpush.bf16.msra.mxu0 %v624_v2  ;;  %v651_v2 = vld [vmem:[%s927_s14 + $0x28] sm:$0xff]  ;;  %v660_v24 = vld [vmem:[%s928_s15] ss:$0 sm:$0xff] }
  0x11   :  { %174 = vmatpush.bf16.msra.mxu1 %v632_v3  ;;  %v650_v3 = vld [vmem:[%s927_s14 + $0x20] sm:$0xff] }
  0x13   :  { %506 = vmatmul.msk.bf16.vlgmr.msra.gmra.mxu0 %vm84_vm0, %v623_v4  ;;  %380 = vmatpush.bf16.msrb.mxu2 %v645_v37 }
  0x14   :  { %284 = vmatpush.bf16.msrb.mxu0 %v641_v11  ;;  %462 = vmatpush.bf16.msra.mxu3 %v652_v1 }
  0x15   :  { %175 = vmatpush.bf16.msra.mxu1 %v631_v5  ;;  %v658_v5 = vld [vmem:[%s939_s27] ss:$0 sm:$0xff] }
  0x17   :  { %381 = vmatpush.bf16.msrb.mxu2 %v644_v61 }
  0x18   :  { %285 = vmatpush.bf16.msrb.mxu0 %v640_v21  ;;  %463 = vmatpush.bf16.msra.mxu3 %v651_v2 }
  0x19   :  { %176 = vmatpush.bf16.msra.mxu1 %v630_v6 }
  0x1b   :  { %382 = vmatpush.bf16.msrb.mxu2 %v643_v62 }
  0x1c   :  { %286 = vmatpush.bf16.msrb.mxu0 %v639_v23  ;;  %464 = vmatpush.bf16.msra.mxu3 %v650_v3 }
  0x1d   :  { %177 = vmatpush.bf16.msra.mxu1 %v629_v7 }
  0x1f   :  { %383 = vmatpush.bf16.msrb.mxu2 %v642_v63 }
  0x20   :  { %287 = vmatpush.bf16.msrb.mxu0 %v638_v25 }
  0x21   :  { %178 = vmatpush.bf16.msra.mxu1 %v628_v8 }
  0x24   :  { %327 = vmatpush.bf16.msra.mxu0 %v318_v36 }
  0x25   :  { %179 = vmatpush.bf16.msra.mxu1 %v627_v9 }
  0x29   :  { %180 = vmatpush.bf16.msra.mxu1 %v626_v10 }
  0x90   :  { %v97_v12 = vpop.f32.mrf.mxu0 }
  0x91   :  { %v98_v14 = vadd.f32 %v654_v13, %v97_v12  ;;  %v649_v12 = vld [vmem:[%s927_s14 + $0x18] sm:$0xff] }
  0x92   :  { %465 = vmatpush.bf16.msra.mxu3 %v649_v12 }
  0x93   :  { %v102_v17 = vmax.f32 %v98_v14, 0.0  ;;  %v647_v14 = vld [vmem:[%s927_s14 + $0x8] sm:$0xff] }
  0x98   :  { %v99_v15 = vpop.f32.mrf.mxu0 }
  0x99   :  { %v100_v16 = vadd.f32 %v654_v13, %v99_v15  ;;  %v648_v13 = vld [vmem:[%s927_s14 + $0x10] sm:$0xff]  ;;  %v646_v15 = vld [vmem:[%s927_s14] sm:$0xff] }
  0x9a   :  { %466 = vmatpush.bf16.msra.mxu3 %v648_v13 }
  0x9b   :  { %v103_v18 = vmax.f32 %v100_v16, 0.0 }
  0x9d   :  { %v104_v19 = vpack.c.bf16 %v103_v18, %v102_v17  ;;  %v659_v17 = vld [vmem:[%s926_s13] ss:$0 sm:$0xff] }
  0x9e   :  { %467 = vmatpush.bf16.msra.mxu3 %v647_v14 }
  0x9f   :  { %181 = vmatmul.bf16.vlgmr.msra.gmra.mxu1 %v104_v19 }
  0xa2   :  { %468 = vmatpush.bf16.msra.mxu3 %v646_v15 }
 0x11c   :  { %v182_v27 = vpop.f32.mrf.mxu1 }
 0x11d   :  { %v183_v29 = vadd.f32 %v655_v28, %v182_v27 }
 0x11f   :  { %v187_v32 = vmax.f32 %v183_v29, 0.0 }
 0x124   :  { %v184_v30 = vpop.f32.mrf.mxu1 }
 0x125   :  { %v185_v31 = vadd.f32 %v655_v28, %v184_v30 }
 0x127   :  { %v188_v33 = vmax.f32 %v185_v31, 0.0 }
 0x129   :  { %v189_v34 = vpack.c.bf16 %v188_v33, %v187_v32 }
 0x12b   :  { %555 = vmatmul.msk.bf16.vlgmr.msra.gmra.mxu2 %vm226_vm1, %v189_v34  ;;  %572 = vmatmul.msk.bf16.vlgmr.msrb.gmra.mxu0 %vm226_vm1, %v189_v34 }
 0x1a8   :  { %v289_v39 = vpop.f32.mrf.mxu0 }
 0x1a9   :  { %v290_v40 = vadd.f32 %v656_v38, %v289_v39 }
 0x1ab   :  { %v294_v41 = vmul.f32 0.5, %v290_v40  ;;  %480 = vst.msk [vmem:[%s923_s18] sm:$0xff] %vm477_vm3, %v290_v40 }
 0x1ad   :  { %v296_v44 = vmul.f32 1.442695, %v294_v41 }
 0x1ae   :  { %v239_v43 = vpop.f32.mrf.mxu2 }
 0x1af   :  { %v240_v45 = vadd.f32 %v657_v42, %v239_v43  ;;  %661 = vpow2.f32 %v296_v44 }
 0x1b0   :  { %v291_v46 = vpop.f32.mrf.mxu0 }
 0x1b1   :  { %478 = vst.msk [vmem:[%s924_s17] sm:$0xff] %vm477_vm3, %v240_v45  ;;  %v292_v47 = vadd.f32 %v656_v38, %v291_v46 }
 0x1b3   :  { %v295_v48 = vmul.f32 0.5, %v292_v47  ;;  %481 = vst.msk [vmem:[%s923_s18 + $0x8] sm:$0xff] %vm477_vm3, %v292_v47 }
 0x1b5   :  { %v298_v49 = vmul.f32 1.442695, %v295_v48  ;;  %v662_v52 = vpop.eup %661 }
 0x1b6   :  { %v241_v50 = vpop.f32.mrf.mxu2  ;;  %v302_v55 = vmul.f32 %v662_v52, %v300_v53 }
 0x1b7   :  { %663 = vpow2.f32 %v298_v49  ;;  %v242_v51 = vadd.f32 %v657_v42, %v241_v50 }
 0x1b8   :  { %v304_v58 = vadd.f32 %v302_v55, %v240_v45 }
 0x1b9   :  { %479 = vst.msk [vmem:[%s924_s17 + $0x8] sm:$0xff] %vm477_vm3, %v242_v51 }
 0x1bd   :  { %v664_v56 = vpop.eup %663 }
 0x1be   :  { %v303_v57 = vmul.f32 %v664_v56, %v301_v54 }
 0x1c0   :  { %v305_v59 = vadd.f32 %v303_v57, %v242_v51 }
 0x1c2   :  { %v306_v60 = vpack.c.bf16 %v305_v59, %v304_v58 }
 0x1c4   :  { %573 = vmatmul.msk.bf16.vlgmr.msra.gmra.mxu0 %vm312_vm4, %v306_v60 }
 0x241   :  { %v329_v4 = vpop.f32.mrf.mxu0 }
 0x242   :  { %v330_v6 = vadd.f32 %v658_v5, %v329_v4 }
 0x244   :  { %v334_v9 = vmax.f32 %v330_v6, 0.0 }
 0x249   :  { %v331_v7 = vpop.f32.mrf.mxu0 }
 0x24a   :  { %v332_v8 = vadd.f32 %v658_v5, %v331_v7 }
 0x24c   :  { %v335_v10 = vmax.f32 %v332_v8, 0.0 }
 0x24e   :  { %v336_v11 = vpack.c.bf16 %v335_v10, %v334_v9 }
 0x250   :  { %590 = vmatmul.msk.bf16.vlgmr.msrb.gmra.mxu2 %vm226_vm1, %v336_v11 }
 0x2d3   :  { %v385_v16 = vpop.f32.mrf.mxu2 }
 0x2d4   :  { %v386_v18 = vadd.f32 %v659_v17, %v385_v16 }
 0x2d6   :  { %v390_v21 = vmax.f32 %v386_v18, 0.0 }
 0x2db   :  { %v387_v19 = vpop.f32.mrf.mxu2 }
 0x2dc   :  { %v388_v20 = vadd.f32 %v659_v17, %v387_v19 }
 0x2de   :  { %v391_v22 = vmax.f32 %v388_v20, 0.0 }
 0x2e0   :  { %v392_v23 = vpack.c.bf16 %v391_v22, %v390_v21 }
 0x2e2   :  { %469 = vmatmul.bf16.vlgmr.msra.gmra.mxu3 %v392_v23 }
 0x365   :  { %v470_v25 = vpop.f32.mrf.mxu3 }
 0x366   :  { %v471_v26 = vadd.f32 %v660_v24, %v470_v25 }
 0x368   :  { %475 = vst.msk [vmem:[%s929_s16] sm:$0xff] %vm84_vm0, %v471_v26 }
 0x36d   :  { %v472_v27 = vpop.f32.mrf.mxu3 }
 0x36e   :  { %v473_v28 = vadd.f32 %v660_v24, %v472_v27 }
 0x370   :  { %476 = vst.msk [vmem:[%s929_s16 + $0x8] sm:$0xff] %vm84_vm0, %v473_v28 }

</bundles_post_ra>
